<compile_context>
chip_gen: v6e
topology: v6e:2x2x1
jax: 0.10.0
libtpu: 0.0.40
codegen_flags: <defaults>
</compile_context>

<pallas_src>
import functools

import jax
import jax.numpy as jnp
from jax.experimental import pallas as pl
from jax.experimental.pallas import tpu as pltpu

# ---- module hyper-parameters (synthetic, small) -----------------------------
N_NODES = 16
EMBED = 8                        # embedding_size
N_NEURONS = (32, 16, 16)         # n_neurons_target
ACTION_SIZE = 16
INPUT_SIZE = 2 * N_NODES + 2 * EMBED     # 2*n_nodes + 2*embedding_size = 48
H0, H1, H2 = N_NEURONS
LANE = 128                       # lane-dense padding width
FC1_K = 32                       # padded fc1 contraction: [state(16) | emb(8) | 0(8)]

# ---- packed bf16 weight-slab layout (all block offsets multiples of 16) ------
ROW_HDR = 0          # 16-row header block holding gc1_w + every bias row
HDR_GC1_W = 0        # (1, H0)
HDR_GC1_B = 1        # (1, H0)
HDR_GC2_B = 2        # (1, EMBED)
HDR_FC1_B = 3        # (1, 2*H0)
HDR_FC2_B = 4        # (1, 2*H1)
HDR_FC3_B = 5        # (1, 4*H2)   [fc3_value_b | fc3_adv_b]
HDR_OUT_B = 6        # (1, A+1)    [out_adv_b | out_value_b]
ROW_GC2_W = 16       # (32, 128)   gc2_w (H0, EMBED) in lanes 0:EMBED
ROW_FC1_WS = 48      # (32, 128)   [fc1_w rows for state[start]; rows for emb[start]; 0]
ROW_FC1_WE = 80      # (32, 128)   [fc1_w rows for state[end]  ; rows for emb[end]  ; 0]
ROW_FC2_W = 112      # (64, 128)   fc2_w (2*H0, 2*H1) in lanes 0:2*H1
ROW_FC3_W = 176      # (32, 128)   [fc3_value_w | fc3_adv_w] in lanes 0:4*H2
ROW_OUT_W = 208      # (64, 128)   block-diag: rows 0:2*H2 -> value lane A, rows 2*H2:4*H2 -> adv lanes 0:A
SLAB_ROWS = 272      # 272 x 128 x bf16 = 68 KiB


# ---------------------------- fused kernel ------------------------------------
def _fused_kernel(idx_ref, state_ref, slab_ref, out_ref):
    f32 = jnp.float32
    state = state_ref[...]                                        # (N, N) f32
    n = state.shape[0]

    # One aligned 16-row bf16 read for gc1_w + all biases, upcast once.
    hdr = slab_ref[ROW_HDR:ROW_HDR + 16, :].astype(f32)           # (16, 128)
    gc1_w = hdr[HDR_GC1_W:HDR_GC1_W + 1, :]
    gc1_b = hdr[HDR_GC1_B:HDR_GC1_B + 1, :]
    gc2_b = hdr[HDR_GC2_B:HDR_GC2_B + 1, :]
    fc1_b = hdr[HDR_FC1_B:HDR_FC1_B + 1, :]
    fc2_b = hdr[HDR_FC2_B:HDR_FC2_B + 1, :]
    fc3_b = hdr[HDR_FC3_B:HDR_FC3_B + 1, :]
    out_b = hdr[HDR_OUT_B:HDR_OUT_B + 1, :]

    # --- GCN: diag as node feature, diagonal-zeroed adjacency -----------------
    rows = jax.lax.broadcasted_iota(jnp.int32, (n, n), 0)
    cols = jax.lax.broadcasted_iota(jnp.int32, (n, n), 1)
    diag_mask = rows == cols
    x = jnp.sum(jnp.where(diag_mask, state, 0.0), axis=1, keepdims=True)  # (N,1)
    adj = jnp.where(diag_mask, 0.0, state)                                # (N,N)

    # GC1: support = x @ W1 is a rank-1 outer product (K == 1) -> VPU broadcast.
    support1 = x * gc1_w                                          # (N,128)
    h1 = jnp.dot(adj, support1, preferred_element_type=f32) + gc1_b
    h1 = jnp.maximum(h1, 0.0)                                     # relu; lanes H0: are 0
    # fn.dropout(p=0.5) -> identity at inference

    # GC2: contract only the H0 valid lanes against a 32-row weight block.
    gc2_w = slab_ref[ROW_GC2_W:ROW_GC2_W + H0, :].astype(f32)     # (32,128)
    support2 = jnp.dot(h1[:, :H0], gc2_w, preferred_element_type=f32)
    h2 = jnp.maximum(jnp.dot(adj, support2, preferred_element_type=f32) + gc2_b, 0.0)

    # log_softmax over the EMBED valid feature lanes only (f32 EUP/VPU math)
    logits = h2[:, :EMBED]                                        # (N, EMBED)
    m = jnp.max(logits, axis=1, keepdims=True)
    z = logits - m
    emb = z - jnp.log(jnp.sum(jnp.exp(z), axis=1, keepdims=True))  # (N, EMBED)

    # --- edge gather folded into fc1 (one-hot selection matmul) ---------------
    idx = idx_ref[...]                                            # (B, 2) int32
    b = idx.shape[0]
    start_col = idx[:, 0:1]
    end_col = idx[:, 1:2]
    ids = jax.lax.broadcasted_iota(jnp.int32, (b, 2 * n), 1)      # (B, 2N)
    # sel lanes 0:N one-hot start, lanes N:2N one-hot end
    sel = jnp.where((ids == start_col) | (ids == end_col + n), 1.0, 0.0)

    # fc1 folded through the gather by linearity:
    #   edge_features @ W1 = sel_s @ (se @ W_s) + sel_e @ (se @ W_e),
    #   se = [state | emb | 0]  (N, 32)
    se = jnp.concatenate(
        [state, emb, jnp.zeros((n, FC1_K - n - EMBED), f32)], axis=1)      # (N,32)
    w_s = slab_ref[ROW_FC1_WS:ROW_FC1_WS + FC1_K, :].astype(f32)           # (32,128)
    w_e = slab_ref[ROW_FC1_WE:ROW_FC1_WE + FC1_K, :].astype(f32)           # (32,128)
    w_se = jnp.concatenate([w_s, w_e], axis=1)                             # (32,256)
    a_wide = jnp.dot(se, w_se, preferred_element_type=f32)                 # (N,256)
    a_stack = jnp.concatenate([a_wide[:, :LANE], a_wide[:, LANE:]], axis=0)  # (2N,128)
    h = jnp.maximum(jnp.dot(sel, a_stack, preferred_element_type=f32) + fc1_b, 0.0)

    # fc2 (valid input lanes 0:2*H0)
    fc2_w = slab_ref[ROW_FC2_W:ROW_FC2_W + 2 * H0, :].astype(f32)          # (64,128)
    h = jnp.maximum(
        jnp.dot(h[:, :2 * H0], fc2_w, preferred_element_type=f32) + fc2_b, 0.0)
    # d1 dropout -> identity at inference

    # merged value/adv branch: lanes 0:2*H2 = value branch, 2*H2:4*H2 = adv branch
    fc3_w = slab_ref[ROW_FC3_W:ROW_FC3_W + 2 * H1, :].astype(f32)          # (32,128)
    h3 = jnp.maximum(
        jnp.dot(h[:, :2 * H1], fc3_w, preferred_element_type=f32) + fc3_b, 0.0)

    # block-diagonal output: lanes 0:A = advantage, lane A = value
    out_w = slab_ref[ROW_OUT_W:ROW_OUT_W + 4 * H2, :].astype(f32)          # (64,128)
    va = jnp.dot(h3[:, :4 * H2], out_w, preferred_element_type=f32) + out_b  # (B,128)

    adv = va[:, :ACTION_SIZE]                                     # (B, A)
    val = va[:, ACTION_SIZE:ACTION_SIZE + 1]                      # (B, 1)
    adv_avg = jnp.mean(adv, axis=1, keepdims=True)
    # Lane-dense store: lanes >= ACTION_SIZE are don't-care and sliced host-side.
    out_ref[...] = val + va - adv_avg


def graph_action_network_forward(weight_slab, state, start, end):
    """Fused forward. `weight_slab` is the packed (SLAB_ROWS, 128) bf16 slab."""
    state = state.astype(jnp.float32)
    b = start.shape[0]
    idx = jnp.stack([start.astype(jnp.int32), end.astype(jnp.int32)], axis=1)  # (B,2)

    vmem = pl.BlockSpec(memory_space=pltpu.MemorySpace.VMEM)
    q_full = pl.pallas_call(
        _fused_kernel,
        out_shape=jax.ShapeDtypeStruct((b, LANE), jnp.float32),
        in_specs=[vmem, vmem, vmem],
        out_specs=vmem,
        compiler_params=pltpu.CompilerParams(vmem_limit_bytes=8 * 1024 * 1024),
    )(idx, state, weight_slab)
    q = q_full[:, :ACTION_SIZE]
    # torch .squeeze(0): only drops the leading axis when it is size 1
    return q[0] if q.shape[0] == 1 else q


# ---------------------------- host-side weight packing ------------------------
def pack_params(p):
    """Pack all weights/biases into one lane-dense (SLAB_ROWS, 128) bf16 slab."""
    slab = jnp.zeros((SLAB_ROWS, LANE), jnp.float32)
    # header: gc1_w + all biases
    slab = slab.at[HDR_GC1_W, :H0].set(p["gc1_w"][0])
    slab = slab.at[HDR_GC1_B, :H0].set(p["gc1_b"][0])
    slab = slab.at[HDR_GC2_B, :EMBED].set(p["gc2_b"][0])
    slab = slab.at[HDR_FC1_B, :2 * H0].set(p["fc1_b"][0])
    slab = slab.at[HDR_FC2_B, :2 * H1].set(p["fc2_b"][0])
    slab = slab.at[HDR_FC3_B, :2 * H2].set(p["fc3v_b"][0])
    slab = slab.at[HDR_FC3_B, 2 * H2:4 * H2].set(p["fc3a_b"][0])
    slab = slab.at[HDR_OUT_B, :ACTION_SIZE].set(p["outa_b"][0])
    slab = slab.at[HDR_OUT_B, ACTION_SIZE].set(p["outv_b"][0, 0])
    # GCN layer 2
    slab = slab.at[ROW_GC2_W:ROW_GC2_W + H0, :EMBED].set(p["gc2_w"])
    # fc1 rows split by which edge-feature segment they multiply:
    #   rows 0:16 -> state[start], 16:32 -> state[end], 32:40 -> emb[start], 40:48 -> emb[end]
    slab = slab.at[ROW_FC1_WS:ROW_FC1_WS + N_NODES, :2 * H0].set(p["fc1_w"][0:N_NODES])
    slab = slab.at[ROW_FC1_WS + N_NODES:ROW_FC1_WS + N_NODES + EMBED, :2 * H0].set(
        p["fc1_w"][2 * N_NODES:2 * N_NODES + EMBED])
    slab = slab.at[ROW_FC1_WE:ROW_FC1_WE + N_NODES, :2 * H0].set(
        p["fc1_w"][N_NODES:2 * N_NODES])
    slab = slab.at[ROW_FC1_WE + N_NODES:ROW_FC1_WE + N_NODES + EMBED, :2 * H0].set(
        p["fc1_w"][2 * N_NODES + EMBED:])
    # fc2
    slab = slab.at[ROW_FC2_W:ROW_FC2_W + 2 * H0, :2 * H1].set(p["fc2_w"])
    # merged fc3_value | fc3_adv
    slab = slab.at[ROW_FC3_W:ROW_FC3_W + 2 * H1, :2 * H2].set(p["fc3v_w"])
    slab = slab.at[ROW_FC3_W:ROW_FC3_W + 2 * H1, 2 * H2:4 * H2].set(p["fc3a_w"])
    # block-diagonal out_value / out_adv : lanes 0:A = adv, lane A = value
    slab = slab.at[ROW_OUT_W:ROW_OUT_W + 2 * H2, ACTION_SIZE].set(p["outv_w"][:, 0])
    slab = slab.at[ROW_OUT_W + 2 * H2:ROW_OUT_W + 4 * H2, :ACTION_SIZE].set(p["outa_w"])
    # bf16 storage halves the weight DMA; math stays f32 in-kernel.
    return slab.astype(jnp.bfloat16)


# ---------------------------- deterministic params ----------------------------
def init_params(key):
    def uniform(k, shape, bound):
        return jax.random.uniform(k, shape, jnp.float32, -bound, bound)

    ks = jax.random.split(key, 16)
    p = {}
    # GraphConvolution: stdv = 1/sqrt(out_features)
    p["gc1_w"] = uniform(ks[0], (1, H0), 1.0 / jnp.sqrt(H0))
    p["gc1_b"] = uniform(ks[1], (1, H0), 1.0 / jnp.sqrt(H0))
    p["gc2_w"] = uniform(ks[2], (H0, EMBED), 1.0 / jnp.sqrt(EMBED))
    p["gc2_b"] = uniform(ks[3], (1, EMBED), 1.0 / jnp.sqrt(EMBED))

    def xavier(k, fan_in, fan_out):
        bound = jnp.sqrt(6.0 / (fan_in + fan_out))
        return uniform(k, (fan_in, fan_out), bound)   # (in, out) layout

    p["fc1_w"] = xavier(ks[4], INPUT_SIZE, 2 * H0)
    p["fc1_b"] = jnp.zeros((1, 2 * H0), jnp.float32)
    p["fc2_w"] = xavier(ks[5], 2 * H0, 2 * H1)
    p["fc2_b"] = jnp.zeros((1, 2 * H1), jnp.float32)
    p["fc3v_w"] = xavier(ks[6], 2 * H1, 2 * H2)
    p["fc3v_b"] = jnp.zeros((1, 2 * H2), jnp.float32)
    p["outv_w"] = xavier(ks[7], 2 * H2, 1)
    p["outv_b"] = jnp.zeros((1, 1), jnp.float32)
    p["fc3a_w"] = xavier(ks[8], 2 * H1, 2 * H2)
    p["fc3a_b"] = jnp.zeros((1, 2 * H2), jnp.float32)
    p["outa_w"] = xavier(ks[9], 2 * H2, ACTION_SIZE)
    p["outa_b"] = jnp.zeros((1, ACTION_SIZE), jnp.float32)
    return p


# ---------------------------- pure-JAX reference (semantics check) ------------
def reference_forward(p, state, start, end):
    mm = functools.partial(jnp.dot, precision=jax.lax.Precision.HIGHEST)
    x = jnp.diag(state)[:, None]
    adj = state * (1.0 - jnp.eye(N_NODES, dtype=state.dtype))
    h = jax.nn.relu(mm(adj, mm(x, p["gc1_w"])) + p["gc1_b"])
    h = jax.nn.relu(mm(adj, mm(h, p["gc2_w"])) + p["gc2_b"])
    emb = jax.nn.log_softmax(h, axis=1)
    ef = jnp.concatenate([state[start], state[end], emb[start], emb[end]], axis=1)
    h = jax.nn.relu(mm(ef, p["fc1_w"]) + p["fc1_b"])
    h = jax.nn.relu(mm(h, p["fc2_w"]) + p["fc2_b"])
    v = mm(jax.nn.relu(mm(h, p["fc3v_w"]) + p["fc3v_b"]), p["outv_w"]) + p["outv_b"]
    a = mm(jax.nn.relu(mm(h, p["fc3a_w"]) + p["fc3a_b"]), p["outa_w"]) + p["outa_b"]
    q = v + a - jnp.mean(a, axis=1, keepdims=True)
    return q[0] if q.shape[0] == 1 else q


if __name__ == "__main__":
    key = jax.random.PRNGKey(0)
    k_param, k_state = jax.random.split(key)
    params = init_params(k_param)
    weight_slab = pack_params(params)          # packed + bf16-quantized once at setup

    # The kernel deliberately stores weights in bf16 (perf item 1), so the
    # semantic reference uses the identical bf16-quantized effective weights.
    params_q = {k: v.astype(jnp.bfloat16).astype(jnp.float32) for k, v in params.items()}

    # synthetic "state": dense weighted adjacency with nonzero diagonal
    state = jax.random.uniform(k_state, (N_NODES, N_NODES), jnp.float32)
    start = jnp.array([0, 3, 5, 7], dtype=jnp.int32)   # batch of 4 edges
    end = jnp.array([1, 4, 6, 8], dtype=jnp.int32)

    fwd = jax.jit(graph_action_network_forward)
    out = jax.block_until_ready(fwd(weight_slab, state, start, end))

    assert out.shape == (4, ACTION_SIZE), out.shape
    assert bool(jnp.all(jnp.isfinite(out)))
    ref = reference_forward(params_q, state, start, end)
    assert jnp.allclose(out, ref, rtol=5e-3, atol=5e-3), float(jnp.max(jnp.abs(out - ref)))
    print("KERNEL_OK")
</pallas_src>

<mosaic_0001>
module attributes {stable_mosaic.version = 11 : i64} {
  func.func @_fused_kernel(%arg0: memref<4x2xi32, #tpu.memory_space<vmem>>, %arg1: memref<16x16xf32, #tpu.memory_space<vmem>>, %arg2: memref<272x128xbf16, #tpu.memory_space<vmem>>, %arg3: memref<4x128xf32, #tpu.memory_space<vmem>>) attributes {dimension_semantics = [], scalar_prefetch = 0 : i64, scratch_operands = 0 : i64, tpu.core_type = #tpu.core_type<tc>} {
    %c0 = arith.constant 0 : index
    %c0_0 = arith.constant 0 : index
    %0 = vector.load %arg1[%c0, %c0_0] : memref<16x16xf32, #tpu.memory_space<vmem>>, vector<16x16xf32>
    %c0_1 = arith.constant 0 : index
    %c0_2 = arith.constant 0 : index
    %1 = vector.load %arg2[%c0_1, %c0_2] : memref<272x128xbf16, #tpu.memory_space<vmem>>, vector<16x128xbf16>
    %2 = arith.extf %1 : vector<16x128xbf16> to vector<16x128xf32>
    %3 = vector.extract_strided_slice %2 {offsets = [0, 0], sizes = [1, 128], strides = [1, 1]} : vector<16x128xf32> to vector<1x128xf32>
    %4 = vector.extract_strided_slice %2 {offsets = [1, 0], sizes = [1, 128], strides = [1, 1]} : vector<16x128xf32> to vector<1x128xf32>
    %5 = vector.extract_strided_slice %2 {offsets = [2, 0], sizes = [1, 128], strides = [1, 1]} : vector<16x128xf32> to vector<1x128xf32>
    %6 = vector.extract_strided_slice %2 {offsets = [3, 0], sizes = [1, 128], strides = [1, 1]} : vector<16x128xf32> to vector<1x128xf32>
    %7 = vector.extract_strided_slice %2 {offsets = [4, 0], sizes = [1, 128], strides = [1, 1]} : vector<16x128xf32> to vector<1x128xf32>
    %8 = vector.extract_strided_slice %2 {offsets = [5, 0], sizes = [1, 128], strides = [1, 1]} : vector<16x128xf32> to vector<1x128xf32>
    %9 = vector.extract_strided_slice %2 {offsets = [6, 0], sizes = [1, 128], strides = [1, 1]} : vector<16x128xf32> to vector<1x128xf32>
    %10 = tpu.iota {dimensions = array<i32: 0>} : vector<16x16xi32>
    %11 = tpu.iota {dimensions = array<i32: 1>} : vector<16x16xi32>
    %12 = arith.cmpi eq, %10, %11 : vector<16x16xi32>
    %cst = arith.constant 0.000000e+00 : f32
    %13 = vector.broadcast %cst : f32 to vector<16x16xf32>
    %14 = arith.select %12, %0, %13 : vector<16x16xi1>, vector<16x16xf32>
    %cst_3 = arith.constant dense<0.000000e+00> : vector<16xf32>
    %15 = vector.multi_reduction <add>, %14, %cst_3 [1] : vector<16x16xf32> to vector<16xf32>
    %16 = vector.shape_cast %15 : vector<16xf32> to vector<16x1xf32>
    %cst_4 = arith.constant 0.000000e+00 : f32
    %17 = vector.broadcast %cst_4 : f32 to vector<16x16xf32>
    %18 = arith.select %12, %17, %0 : vector<16x16xi1>, vector<16x16xf32>
    %19 = vector.broadcast %16 : vector<16x1xf32> to vector<16x128xf32>
    %20 = vector.broadcast %3 : vector<1x128xf32> to vector<16x128xf32>
    %21 = arith.mulf %19, %20 : vector<16x128xf32>
    %cst_5 = arith.constant dense<0.000000e+00> : vector<16x128xf32>
    %22 = tpu.matmul %18, %21, %cst_5 {dimension_numbers = #tpu.dot_dimension_numbers<[1], [0], [0], [1], [0, 0, 1, 1], [], []>} : vector<16x16xf32>, vector<16x128xf32>, vector<16x128xf32> -> vector<16x128xf32>
    %23 = vector.broadcast %4 : vector<1x128xf32> to vector<16x128xf32>
    %24 = arith.addf %22, %23 : vector<16x128xf32>
    %cst_6 = arith.constant 0.000000e+00 : f32
    %25 = vector.broadcast %cst_6 : f32 to vector<16x128xf32>
    %26 = arith.maximumf %24, %25 : vector<16x128xf32>
    %c16 = arith.constant 16 : index
    %c0_7 = arith.constant 0 : index
    %27 = vector.load %arg2[%c16, %c0_7] : memref<272x128xbf16, #tpu.memory_space<vmem>>, vector<32x128xbf16>
    %28 = arith.extf %27 : vector<32x128xbf16> to vector<32x128xf32>
    %29 = vector.extract_strided_slice %26 {offsets = [0, 0], sizes = [16, 32], strides = [1, 1]} : vector<16x128xf32> to vector<16x32xf32>
    %cst_8 = arith.constant dense<0.000000e+00> : vector<16x128xf32>
    %30 = tpu.matmul %29, %28, %cst_8 {dimension_numbers = #tpu.dot_dimension_numbers<[1], [0], [0], [1], [0, 0, 1, 1], [], []>} : vector<16x32xf32>, vector<32x128xf32>, vector<16x128xf32> -> vector<16x128xf32>
    %cst_9 = arith.constant dense<0.000000e+00> : vector<16x128xf32>
    %31 = tpu.matmul %18, %30, %cst_9 {dimension_numbers = #tpu.dot_dimension_numbers<[1], [0], [0], [1], [0, 0, 1, 1], [], []>} : vector<16x16xf32>, vector<16x128xf32>, vector<16x128xf32> -> vector<16x128xf32>
    %32 = vector.broadcast %5 : vector<1x128xf32> to vector<16x128xf32>
    %33 = arith.addf %31, %32 : vector<16x128xf32>
    %cst_10 = arith.constant 0.000000e+00 : f32
    %34 = vector.broadcast %cst_10 : f32 to vector<16x128xf32>
    %35 = arith.maximumf %33, %34 : vector<16x128xf32>
    %36 = vector.extract_strided_slice %35 {offsets = [0, 0], sizes = [16, 8], strides = [1, 1]} : vector<16x128xf32> to vector<16x8xf32>
    %cst_11 = arith.constant dense<0xFF800000> : vector<16xf32>
    %37 = vector.multi_reduction <maximumf>, %36, %cst_11 [1] : vector<16x8xf32> to vector<16xf32>
    %38 = vector.shape_cast %37 : vector<16xf32> to vector<16x1xf32>
    %39 = vector.broadcast %38 : vector<16x1xf32> to vector<16x8xf32>
    %40 = arith.subf %36, %39 : vector<16x8xf32>
    %41 = math.exp %40 : vector<16x8xf32>
    %cst_12 = arith.constant dense<0.000000e+00> : vector<16xf32>
    %42 = vector.multi_reduction <add>, %41, %cst_12 [1] : vector<16x8xf32> to vector<16xf32>
    %43 = vector.shape_cast %42 : vector<16xf32> to vector<16x1xf32>
    %44 = math.log %43 : vector<16x1xf32>
    %45 = vector.broadcast %44 : vector<16x1xf32> to vector<16x8xf32>
    %46 = arith.subf %40, %45 : vector<16x8xf32>
    %c0_13 = arith.constant 0 : index
    %c0_14 = arith.constant 0 : index
    %47 = vector.load %arg0[%c0_13, %c0_14] : memref<4x2xi32, #tpu.memory_space<vmem>>, vector<4x2xi32>
    %48 = vector.extract_strided_slice %47 {offsets = [0, 0], sizes = [4, 1], strides = [1, 1]} : vector<4x2xi32> to vector<4x1xi32>
    %49 = vector.extract_strided_slice %47 {offsets = [0, 1], sizes = [4, 1], strides = [1, 1]} : vector<4x2xi32> to vector<4x1xi32>
    %50 = tpu.iota {dimensions = array<i32: 1>} : vector<4x32xi32>
    %51 = vector.broadcast %48 : vector<4x1xi32> to vector<4x32xi32>
    %52 = arith.cmpi eq, %50, %51 : vector<4x32xi32>
    %c16_i32 = arith.constant 16 : i32
    %53 = vector.broadcast %c16_i32 : i32 to vector<4x1xi32>
    %54 = arith.addi %49, %53 : vector<4x1xi32>
    %55 = vector.broadcast %54 : vector<4x1xi32> to vector<4x32xi32>
    %56 = arith.cmpi eq, %50, %55 : vector<4x32xi32>
    %57 = arith.ori %52, %56 : vector<4x32xi1>
    %cst_15 = arith.constant 1.000000e+00 : f32
    %cst_16 = arith.constant 0.000000e+00 : f32
    %58 = vector.broadcast %cst_15 : f32 to vector<4x32xf32>
    %59 = vector.broadcast %cst_16 : f32 to vector<4x32xf32>
    %60 = arith.select %57, %58, %59 : vector<4x32xi1>, vector<4x32xf32>
    %cst_17 = arith.constant 0.000000e+00 : f32
    %61 = vector.broadcast %cst_17 : f32 to vector<16x8xf32>
    %62 = tpu.concatenate %0, %46, %61 in 1 : vector<16x16xf32>, vector<16x8xf32>, vector<16x8xf32> -> vector<16x32xf32>
    %c48 = arith.constant 48 : index
    %c0_18 = arith.constant 0 : index
    %63 = vector.load %arg2[%c48, %c0_18] : memref<272x128xbf16, #tpu.memory_space<vmem>>, vector<32x128xbf16>
    %64 = arith.extf %63 : vector<32x128xbf16> to vector<32x128xf32>
    %c80 = arith.constant 80 : index
    %c0_19 = arith.constant 0 : index
    %65 = vector.load %arg2[%c80, %c0_19] : memref<272x128xbf16, #tpu.memory_space<vmem>>, vector<32x128xbf16>
    %66 = arith.extf %65 : vector<32x128xbf16> to vector<32x128xf32>
    %67 = tpu.concatenate %64, %66 in 1 : vector<32x128xf32>, vector<32x128xf32> -> vector<32x256xf32>
    %cst_20 = arith.constant dense<0.000000e+00> : vector<16x256xf32>
    %68 = tpu.matmul %62, %67, %cst_20 {dimension_numbers = #tpu.dot_dimension_numbers<[1], [0], [0], [1], [0, 0, 1, 1], [], []>} : vector<16x32xf32>, vector<32x256xf32>, vector<16x256xf32> -> vector<16x256xf32>
    %69 = vector.extract_strided_slice %68 {offsets = [0, 0], sizes = [16, 128], strides = [1, 1]} : vector<16x256xf32> to vector<16x128xf32>
    %70 = vector.extract_strided_slice %68 {offsets = [0, 128], sizes = [16, 128], strides = [1, 1]} : vector<16x256xf32> to vector<16x128xf32>
    %71 = tpu.concatenate %69, %70 in 0 : vector<16x128xf32>, vector<16x128xf32> -> vector<32x128xf32>
    %cst_21 = arith.constant dense<0.000000e+00> : vector<4x128xf32>
    %72 = tpu.matmul %60, %71, %cst_21 {dimension_numbers = #tpu.dot_dimension_numbers<[1], [0], [0], [1], [0, 0, 1, 1], [], []>} : vector<4x32xf32>, vector<32x128xf32>, vector<4x128xf32> -> vector<4x128xf32>
    %73 = vector.broadcast %6 : vector<1x128xf32> to vector<4x128xf32>
    %74 = arith.addf %72, %73 : vector<4x128xf32>
    %cst_22 = arith.constant 0.000000e+00 : f32
    %75 = vector.broadcast %cst_22 : f32 to vector<4x128xf32>
    %76 = arith.maximumf %74, %75 : vector<4x128xf32>
    %c112 = arith.constant 112 : index
    %c0_23 = arith.constant 0 : index
    %77 = vector.load %arg2[%c112, %c0_23] : memref<272x128xbf16, #tpu.memory_space<vmem>>, vector<64x128xbf16>
    %78 = arith.extf %77 : vector<64x128xbf16> to vector<64x128xf32>
    %79 = vector.extract_strided_slice %76 {offsets = [0, 0], sizes = [4, 64], strides = [1, 1]} : vector<4x128xf32> to vector<4x64xf32>
    %cst_24 = arith.constant dense<0.000000e+00> : vector<4x128xf32>
    %80 = tpu.matmul %79, %78, %cst_24 {dimension_numbers = #tpu.dot_dimension_numbers<[1], [0], [0], [1], [0, 0, 1, 1], [], []>} : vector<4x64xf32>, vector<64x128xf32>, vector<4x128xf32> -> vector<4x128xf32>
    %81 = vector.broadcast %7 : vector<1x128xf32> to vector<4x128xf32>
    %82 = arith.addf %80, %81 : vector<4x128xf32>
    %cst_25 = arith.constant 0.000000e+00 : f32
    %83 = vector.broadcast %cst_25 : f32 to vector<4x128xf32>
    %84 = arith.maximumf %82, %83 : vector<4x128xf32>
    %c176 = arith.constant 176 : index
    %c0_26 = arith.constant 0 : index
    %85 = vector.load %arg2[%c176, %c0_26] : memref<272x128xbf16, #tpu.memory_space<vmem>>, vector<32x128xbf16>
    %86 = arith.extf %85 : vector<32x128xbf16> to vector<32x128xf32>
    %87 = vector.extract_strided_slice %84 {offsets = [0, 0], sizes = [4, 32], strides = [1, 1]} : vector<4x128xf32> to vector<4x32xf32>
    %cst_27 = arith.constant dense<0.000000e+00> : vector<4x128xf32>
    %88 = tpu.matmul %87, %86, %cst_27 {dimension_numbers = #tpu.dot_dimension_numbers<[1], [0], [0], [1], [0, 0, 1, 1], [], []>} : vector<4x32xf32>, vector<32x128xf32>, vector<4x128xf32> -> vector<4x128xf32>
    %89 = vector.broadcast %8 : vector<1x128xf32> to vector<4x128xf32>
    %90 = arith.addf %88, %89 : vector<4x128xf32>
    %cst_28 = arith.constant 0.000000e+00 : f32
    %91 = vector.broadcast %cst_28 : f32 to vector<4x128xf32>
    %92 = arith.maximumf %90, %91 : vector<4x128xf32>
    %c208 = arith.constant 208 : index
    %c0_29 = arith.constant 0 : index
    %93 = vector.load %arg2[%c208, %c0_29] : memref<272x128xbf16, #tpu.memory_space<vmem>>, vector<64x128xbf16>
    %94 = arith.extf %93 : vector<64x128xbf16> to vector<64x128xf32>
    %95 = vector.extract_strided_slice %92 {offsets = [0, 0], sizes = [4, 64], strides = [1, 1]} : vector<4x128xf32> to vector<4x64xf32>
    %cst_30 = arith.constant dense<0.000000e+00> : vector<4x128xf32>
    %96 = tpu.matmul %95, %94, %cst_30 {dimension_numbers = #tpu.dot_dimension_numbers<[1], [0], [0], [1], [0, 0, 1, 1], [], []>} : vector<4x64xf32>, vector<64x128xf32>, vector<4x128xf32> -> vector<4x128xf32>
    %97 = vector.broadcast %9 : vector<1x128xf32> to vector<4x128xf32>
    %98 = arith.addf %96, %97 : vector<4x128xf32>
    %99 = vector.extract_strided_slice %98 {offsets = [0, 0], sizes = [4, 16], strides = [1, 1]} : vector<4x128xf32> to vector<4x16xf32>
    %100 = vector.extract_strided_slice %98 {offsets = [0, 16], sizes = [4, 1], strides = [1, 1]} : vector<4x128xf32> to vector<4x1xf32>
    %cst_31 = arith.constant dense<0.000000e+00> : vector<4xf32>
    %101 = vector.multi_reduction <add>, %99, %cst_31 [1] : vector<4x16xf32> to vector<4xf32>
    %102 = vector.shape_cast %101 : vector<4xf32> to vector<4x1xf32>
    %cst_32 = arith.constant 1.600000e+01 : f32
    %103 = vector.broadcast %cst_32 : f32 to vector<4x1xf32>
    %104 = arith.divf %102, %103 : vector<4x1xf32>
    %105 = vector.broadcast %100 : vector<4x1xf32> to vector<4x128xf32>
    %106 = arith.addf %105, %98 : vector<4x128xf32>
    %107 = vector.broadcast %104 : vector<4x1xf32> to vector<4x128xf32>
    %108 = arith.subf %106, %107 : vector<4x128xf32>
    %c0_33 = arith.constant 0 : index
    %c0_34 = arith.constant 0 : index
    %109 = vector.load %arg3[%c0_33, %c0_34] : memref<4x128xf32, #tpu.memory_space<vmem>>, vector<4x128xf32>
    tpu.vector_store %arg3[%c0_33, %c0_34], %108 {strides = array<i32>} : memref<4x128xf32, #tpu.memory_space<vmem>>, vector<4x128xf32>,
    return
  }
}

</mosaic_0001>

<bundles_post_ra>
// kernel: graph_action_network_forward.1
= control target key start
LH: loop header
LB: loop body
LE: loop exit
PB: predicated region body
PF: predicated region fallthrough
CT: control target
= control target key end

     0   :  { %8 = vsyncpa [#allocation3], 0  ;;  %s1270_s0 = inlined_call_operand.vmem [shape: s32[4,2], index: 0, kind: input, shape index: {}]   ;;  %s1271_s1 = inlined_call_operand.vmem [shape: f32[16,16], index: 1, kind: input, shape index: {}]   ;;  %s1272_s2 = inlined_call_operand.hbm [shape: bf16[272,128], index: 2, kind: input, shape index: {}]   ;;  %s1273_s3 = inlined_call_operand.hbm [shape: f32[4,128], index: 3, kind: output, shape index: {}]  }
   0x1   :  { %9 = vsyncpa [#allocation4], 0  ;;  %s1130_s12 = smov [#allocation2]  }
   0x2   :  { %s19_s13 = sshll.u32 %s1130_s12, 4  ;;  %s20_s13 = int_to_ptr.vmem [resolvable:$true] %s19_s13 }
   0x3   :  { %s1094_s14 = scalar_lea.vmem %s20_s13, 2176  ;;  %p1099_p1 = scmp.lt.s32.totalorder %s20_s13, %s20_s13 }
   0x4   :  { %p1095_p0 = scmp.ne.s32.totalorder %s20_s13, %s1094_s14  ;;  %p1100_p2 = scmp.lt.s32.totalorder %s1094_s14, %s1094_s14 }
   0x6   :  { %p1101_p3 = por %p1100_p2, %p1099_p1 }
   0x8   :  { %p1102_p4 = pnand %p1101_p3, %p1095_p0 }
   0xa   :  { %1105 = shalt.err (!%p1102_p4)
}
   0xb   :  { %s1131_s15 = smov 64   ;;  %s1132_s16 = smov 4  }
   0xc   :  { %25 = dma.hbm_to_vmem [thread:$0]  %s1272_s2, 2176, %s20_s13, [#allocation3], %s1131_s15, %s1131_s15, %s1132_s16  }
   0xd   :  { %1126 = dma.done.wait [#allocation3], 2176  }
   0xe   :  { %1127 = vsyncadd [#allocation3], 4294965120  ;;  %v33_v0 = vlaneseq  ;;  %vm42_vm2 = vcmask 130048   ;;  %v1174_v4 = vld [vmem:[%s1271_s1 + $0x8] sm:$0xff]  ;;  %v1179_v5 = vld [vmem:[%s1271_s1] sm:$0xff]  ;;  %vm152_vm3 = vcmask 261120  }
   0xf   :  { %v31_v11 = vld [vmem:[#allocation2] sm:$0xf]  ;;  %v922_v20 = vld [vmem:[#allocation2 + $0x10] sm:$0xff]   ;;  %v921_v23 = vld [vmem:[#allocation2 + $0x8] sm:$0xff]   ;;  %vm315_vm4 = vcmask 64512   ;;  %s1135_s1 = smov 16  }
  0x10   :  { %v1163_v1 = vshrl.u32 %v33_v0, 7  ;;  %v1165_v2 = vand.u32 127, %v33_v0  ;;  %v1189_v12 = vunpack.c.l.bf16 %v31_v11  ;;  %v864_v21 = vunpack.c.h.bf16 %v922_v20  ;;  %v926_v56 = vld [vmem:[#allocation2 + $0x30] sm:$0xff]   ;;  %v924_v57 = vld [vmem:[#allocation2 + $0x20] sm:$0xff]   ;;  %v925_v58 = vld [vmem:[#allocation2 + $0x28] sm:$0xff]  }
  0x11   :  { %v863_v22 = vunpack.c.l.bf16 %v922_v20  ;;  %v860_v24 = vunpack.c.h.bf16 %v921_v23  ;;  %v859_v25 = vunpack.c.l.bf16 %v921_v23  ;;  %v880_v59 = vunpack.c.h.bf16 %v926_v56  ;;  %v923_v62 = vld [vmem:[#allocation2 + $0x18] sm:$0xff]  }
  0x12   :  { %v35_v3 = vadd.s32 8, %v1163_v1  ;;  %vm38_vm0 = vcmp.eq.s32.totalorder %v1163_v1, %v1165_v2  ;;  %v53_v13 = vsub.s32 0, %v1163_v1  ;;  %986 = vmatprep.subr.mxu1 %v864_v21  ;;  %v59_v26 = vsub.s32 1, %v1163_v1 }
  0x13   :  { %v40_v7 = vsel %vm38_vm0, %v1179_v5, 0.0  ;;  %v49_v10 = vsel %vm38_vm0, 0.0, %v1179_v5  ;;  %987 = vmatpush3.msra.mxu1 %v864_v21  ;;  %v236_v36 = vsub.s32 2, %v1163_v1  ;;  %v872_v60 = vunpack.c.h.bf16 %v924_v57 }
  0x14   :  { %vm39_vm1 = vcmp.eq.s32.totalorder %v35_v3, %v1165_v2  ;;  %v43_v9 = vsel %vm42_vm2, %v40_v7, 0.0  ;;  %983 = vmatprep.mubr.msk.f32.mxu0 %vm42_vm2, %v49_v10  ;;  %v54_v14 = vrot.slane %v1189_v12, %v53_v13  ;;  %988 = vmatprep.subr.mxu1 %v863_v22  ;;  %v60_v27 = vrot.slane %v1189_v12, %v59_v26 }
  0x15   :  { %v41_v6 = vsel %vm39_vm1, %v1174_v4, 0.0  ;;  %v50_v19 = vsel %vm39_vm1, 0.0, %v1174_v4  ;;  %989 = vmatpush3.msra.mxu1 %v863_v22  ;;  %v237_v37 = vrot.slane %v1189_v12, %v236_v36  ;;  %v879_v61 = vunpack.c.l.bf16 %v926_v56 }
  0x16   :  { %v46_v8 = vsel %vm42_vm2, %v41_v6, 0.0  ;;  %990 = vmatprep.subr.mxu1 %v860_v24  ;;  %v871_v63 = vunpack.c.l.bf16 %v924_v57  ;;  %v876_v0 = vunpack.c.h.bf16 %v925_v58  ;;  %v868_v3 = vunpack.c.h.bf16 %v923_v62 }
  0x17   :  { %47 = vadd.xlane.f32.xlu0 %v46_v8  ;;  %991 = vmatpush3.msra.mxu1 %v860_v24  ;;  %v875_v8 = vunpack.c.l.bf16 %v925_v58  ;;  %v1134_v11 = vmov 0   ;;  %v1136_v21 = vmov 1   ;;  %vm362_vm5 = vcmask 195584   ;;  %v936_v58 = vld [vmem:[#allocation2 + $0x80] sm:$0xff]  }
  0x18   :  { %992 = vmatprep.subr.mxu1 %v859_v25  ;;  %1074 = vset.pattern.permute.xlu1 %v1134_v11  ;;  %vm1137_vm6 = vmmov 0   ;;  %vm562_vm10 = vcmask 523264   ;;  %v560_v56 = vsub.s32 4, %v1163_v1  ;;  %vm816_vm11 = vcmask 125952  }
  0x19   :  { %993 = vmatpush3.msra.mxu1 %v859_v25 }
  0x1a   :  { %v561_v57 = vrot.slane %v1189_v12, %v560_v56 }
  0x1b   :  { %44 = vadd.xlane.f32.xlu0 %v43_v9  ;;  %v867_v9 = vunpack.c.l.bf16 %v923_v62  ;;  %v920_v62 = vunpack.c.h.bf16 %v936_v58 }
  0xa0   :  { %v48_v15 = vpop.xlane.xlu0 %47 }
  0xa1   :  { %v56_v16 = vmul.f32 %v54_v14, %v48_v15 }
  0xa3   :  { %979 = vmatprep.subr.mxu0 %v56_v16 }
  0xa4   :  { %980 = vmatpush3.msra.mxu0 %v56_v16  ;;  %v45_v17 = vpop.xlane.xlu0 %44 }
  0xa5   :  { %v55_v18 = vmul.f32 %v54_v14, %v45_v17 }
  0xa7   :  { %981 = vmatprep.subr.mxu0 %v55_v18 }
  0xa8   :  { %982 = vmatpush3.msra.mxu0 %v55_v18 }
  0xa9   :  { %984 = vmatmul.mubr.msk.f32.vlgmr.msra.gmra.mxu0 %vm42_vm2, %v50_v19 }
  0xaa   :  { %1001 = vmatprep.mubr.msk.f32.mxu0 %vm42_vm2, %v49_v10  ;;  %v1133_v10 = vmov 0.0  }
  0xab   :  { %1004 = vmatprep.subr.mxu1 %v1133_v10 }
 0x169   :  { %v985_v28 = vpop.f32.mrf.mxu0 }
 0x16a   :  { %v139_v29 = vadd.f32 %v985_v28, %v60_v27  ;;  %v929_v28 = vld [vmem:[#allocation2 + $0x48] sm:$0xff]  }
 0x16b   :  { %v133_v30 = vpop.f32.mrf.mxu0 }
 0x16c   :  { %v134_v31 = vadd.f32 %v133_v30, %v60_v27  ;;  %v143_v33 = vmax.f32 %v139_v29, 0.0 }
 0x16e   :  { %v142_v32 = vmax.f32 %v134_v31, 0.0  ;;  %v892_v31 = vunpack.c.h.bf16 %v929_v28 }
 0x170   :  { %994 = vmatprep.mubr.msk.f32.mxu1 %vm152_vm3, %v142_v32  ;;  %v928_v32 = vld [vmem:[#allocation2 + $0x40] sm:$0xff]  }
 0x171   :  { %995 = vmatmul.mubr.msk.f32.vlgmr.msra.gmra.mxu1 %vm152_vm3, %v143_v33  ;;  %v888_v33 = vunpack.c.h.bf16 %v928_v32 }
 0x172   :  { %1012 = vmatprep.mubr.msk.f32.mxu1 %vm1137_vm6, %v1133_v10 }
 0x231   :  { %v996_v34 = vpop.f32.mrf.mxu1 }
 0x232   :  { %997 = vmatprep.subr.mxu0 %v996_v34 }
 0x233   :  { %v225_v35 = vpop.f32.mrf.mxu1  ;;  %998 = vmatpush3.msra.mxu0 %v996_v34 }
 0x234   :  { %999 = vmatprep.subr.mxu0 %v225_v35 }
 0x235   :  { %1000 = vmatpush3.msra.mxu0 %v225_v35 }
 0x236   :  { %1002 = vmatmul.mubr.msk.f32.vlgmr.msra.gmra.mxu0 %vm42_vm2, %v50_v19  ;;  %411 = vmatprep.subr.mxu0 %v880_v59  ;;  %v340_v19 = vld [vmem:[%s1270_s0] sm:$0xf]  ;;  %s1139_s0 = smov [#allocation5]  }
 0x237   :  { %412 = vmatpush1.msra.mxu0 %v872_v60  ;;  %451 = vmatprep.mubr.f32.mxu0 %v1133_v10  ;;  %v345_v20 = vadd.s32 16, %v340_v19  ;;  %s836_s24 = sshll.u32 %s1139_s0, 4  ;;  %s837_s24 = int_to_ptr.vmem [resolvable:$true] %s836_s24 }
 0x238   :  { %413 = vmatprep.subr.mxu0 %v879_v61  ;;  %s1106_s25 = scalar_lea.vmem %s837_s24, 64  ;;  %p1111_p6 = scmp.lt.s32.totalorder %s837_s24, %s837_s24 }
 0x239   :  { %414 = vmatpush1.msra.mxu0 %v871_v63  ;;  %p1107_p5 = scmp.ne.s32.totalorder %s837_s24, %s1106_s25  ;;  %p1112_p7 = scmp.lt.s32.totalorder %s1106_s25, %s1106_s25 }
 0x23a   :  { %415 = vmatprep.subr.mxu0 %v876_v0  ;;  %v935_v0 = vld [vmem:[#allocation2 + $0x78] sm:$0xff]  }
 0x23b   :  { %416 = vmatpush1.msra.mxu0 %v868_v3  ;;  %v919_v3 = vunpack.c.l.bf16 %v936_v58  ;;  %p1113_p8 = por %p1112_p7, %p1111_p6 }
 0x23c   :  { %417 = vmatprep.subr.mxu0 %v875_v8  ;;  %v915_v8 = vunpack.c.l.bf16 %v935_v0 }
 0x23d   :  { %418 = vmatpush1.msra.mxu0 %v867_v9  ;;  %p1114_p9 = pnand %p1113_p8, %p1107_p5 }
 0x23e   :  { %1015 = vmatprep.subr.mxu0 %v1133_v10 }
 0x2f6   :  { %v1003_v38 = vpop.f32.mrf.mxu0 }
 0x2f7   :  { %v310_v40 = vadd.f32 %v1003_v38, %v237_v37 }
 0x2f8   :  { %v304_v39 = vpop.f32.mrf.mxu0 }
 0x2f9   :  { %v305_v41 = vadd.f32 %v304_v39, %v237_v37  ;;  %v314_v43 = vmax.f32 %v310_v40, 0.0 }
 0x2fb   :  { %v313_v42 = vmax.f32 %v305_v41, 0.0  ;;  %v319_v45 = vsel %vm315_vm4, %v314_v43, -inf  ;;  %v927_v41 = vld [vmem:[#allocation2 + $0x38] sm:$0xff]  }
 0x2fd   :  { %v316_v44 = vsel %vm315_vm4, %v313_v42, -inf }
 0x2fe   :  { %317 = vmax.xlane.f32.xlu1 %v316_v44  ;;  %v932_v44 = vld [vmem:[#allocation2 + $0x60] sm:$0xff]  }
 0x302   :  { %320 = vmax.xlane.f32.xlu1 %v319_v45  ;;  %v904_v45 = vunpack.c.h.bf16 %v932_v44 }
 0x387   :  { %v318_v46 = vpop.xlane.xlu1 %317 }
 0x388   :  { %v322_v47 = vsub.f32 %v313_v42, %v318_v46  ;;  %v884_v42 = vunpack.c.h.bf16 %v927_v41  ;;  %v466_v46 = vsub.s32 3, %v1163_v1 }
 0x38a   :  { %v324_v48 = vmul.f32 1.442695, %v322_v47 }
 0x38b   :  { %v321_v49 = vpop.xlane.xlu1 %320 }
 0x38c   :  { %1078 = vpow2.f32 %v324_v48  ;;  %v323_v50 = vsub.f32 %v314_v43, %v321_v49  ;;  %v883_v43 = vunpack.c.l.bf16 %v927_v41 }
 0x38e   :  { %v326_v51 = vmul.f32 1.442695, %v323_v50 }
 0x390   :  { %1080 = vpow2.f32 %v326_v51 }
 0x399   :  { %v1079_v52 = vpop.eup %1078 }
 0x39a   :  { %v328_v53 = vsel %vm315_vm4, %v1079_v52, 0.0  ;;  %v903_v52 = vunpack.c.l.bf16 %v932_v44 }
 0x39b   :  { %329 = vadd.xlane.f32.xlu0 %v328_v53  ;;  %v931_v53 = vld [vmem:[#allocation2 + $0x58] sm:$0xff]  }
 0x39d   :  { %v1081_v54 = vpop.eup %1080 }
 0x39e   :  { %v331_v55 = vsel %vm315_vm4, %v1081_v54, 0.0  ;;  %v900_v54 = vunpack.c.h.bf16 %v931_v53 }
 0x39f   :  { %332 = vadd.xlane.f32.xlu1 %v331_v55  ;;  %v899_v55 = vunpack.c.l.bf16 %v931_v53 }
 0x424   :  { %v330_v6 = vpop.xlane.xlu0 %329 }
 0x425   :  { %1082 = vlog2.f32 %v330_v6  ;;  %v916_v6 = vunpack.c.h.bf16 %v935_v0 }
 0x428   :  { %v333_v7 = vpop.xlane.xlu1 %332 }
 0x429   :  { %1084 = vlog2.f32 %v333_v7  ;;  %v934_v7 = vld [vmem:[#allocation2 + $0x70] sm:$0xff]  }
 0x42a   :  { %v912_v9 = vunpack.c.h.bf16 %v934_v7  ;;  %v911_v11 = vunpack.c.l.bf16 %v934_v7 }
 0x432   :  { %v1083_v13 = vpop.eup %1082 }
 0x433   :  { %v335_v14 = vmul.f32 0.6931472, %v1083_v13  ;;  %v933_v13 = vld [vmem:[#allocation2 + $0x68] sm:$0xff]  }
 0x435   :  { %v338_v15 = vsub.f32 %v322_v47, %v335_v14  ;;  %v467_v47 = vrot.slane %v1189_v12, %v466_v46  ;;  %v908_v14 = vunpack.c.h.bf16 %v933_v13 }
 0x436   :  { %v1085_v16 = vpop.eup %1084 }
 0x437   :  { %v337_v17 = vmul.f32 0.6931472, %v1085_v16  ;;  %354 = vrot.lane.b32.xlu0 %v338_v15, %s1135_s1  ;;  %v907_v15 = vunpack.c.l.bf16 %v933_v13  ;;  %v647_v16 = vsub.s32 5, %v1163_v1 }
 0x439   :  { %v339_v18 = vsub.f32 %v323_v50, %v337_v17  ;;  %v648_v17 = vrot.slane %v1189_v12, %v647_v16 }
 0x43b   :  { %356 = vrot.lane.b32.xlu1 %v339_v18, %s1135_s1 }
 0x43f   :  { %342 = vperm.xlu1 %1074, %v340_v19  }
 0x443   :  { %1075 = vset.pattern.permute.xlu1 %v1136_v21 }
 0x444   :  { %347 = vperm.xlu1 %1075, %v345_v20  }
 0x4a9   :  { %v355_v22 = vpop.permute.xlu0 %354 }
 0x4aa   :  { %v360_v23 = vsel %vm42_vm2, %v1179_v5, %v355_v22  ;;  %v930_v5 = vld [vmem:[#allocation2 + $0x50] sm:$0xff]   ;;  %v1138_v22 = vmov 16  }
 0x4ab   :  { %v363_v24 = vsel %vm362_vm5, %v360_v23, 0.0  ;;  %v896_v29 = vunpack.c.h.bf16 %v930_v5  ;;  %v895_v30 = vunpack.c.l.bf16 %v930_v5  ;;  %1076 = vset.pattern.permute.xlu1 %v1138_v22  ;;  %1077 = vset.pattern.permute.xlu0 %v1138_v22  ;;  %v741_v23 = vsub.s32 6, %v1163_v1 }
 0x4ac   :  { %851 = vmatmul.mubr.msk.f32.vlgmr.msra.gmra.mxu0 %vm152_vm3, %v363_v24 }
 0x4ad   :  { %v357_v25 = vpop.permute.xlu1 %356  ;;  %457 = vmatprep.mubr.f32.mxu0 %v1133_v10  ;;  %1016 = vmatpush3.msra.mxu0 %v896_v29  ;;  %v742_v24 = vrot.slane %v1189_v12, %v741_v23 }
 0x4ae   :  { %v361_v26 = vsel %vm42_vm2, %v1174_v4, %v357_v25  ;;  %1017 = vmatprep.subr.mxu0 %v1133_v10  ;;  %v891_v4 = vunpack.c.l.bf16 %v929_v28 }
 0x4af   :  { %v364_v27 = vsel %vm362_vm5, %v361_v26, 0.0  ;;  %1018 = vmatpush3.msra.mxu0 %v895_v30 }
 0x4b0   :  { %852 = vmatmul.mubr.msk.f32.gmra.mxu0 %vm152_vm3, %v364_v27  ;;  %1019 = vmatprep.subr.mxu0 %v1133_v10 }
 0x4b1   :  { %1031 = vmatprep.mubr.msk.f32.mxu0 %vm1137_vm6, %v1133_v10  ;;  %1020 = vmatpush3.msra.mxu0 %v892_v31 }
 0x4b2   :  { %1021 = vmatprep.subr.mxu0 %v1133_v10 }
 0x4b3   :  { %1022 = vmatpush3.msra.mxu0 %v891_v4 }
 0x4b4   :  { %1023 = vmatprep.subr.mxu0 %v1133_v10 }
 0x4b5   :  { %1024 = vmatpush3.msra.mxu0 %v888_v33 }
 0x4b6   :  { %1025 = vmatprep.subr.mxu0 %v1133_v10 }
 0x4ba   :  { %v343_v34 = vpop.permute.xlu1 %342 }
 0x4bb   :  { %vm344_vm7 = vcmp.eq.s32.totalorder %v1165_v2, %v343_v34 }
 0x4bf   :  { %v348_v38 = vpop.permute.xlu1 %347 }
 0x4c0   :  { %vm349_vm8 = vcmp.eq.s32.totalorder %v1165_v2, %v348_v38  ;;  %v887_v2 = vunpack.c.l.bf16 %v928_v32 }
 0x4c1   :  { %vm350_vm9 = vmor %vm344_vm7, %vm349_vm8 }
 0x4c2   :  { %v351_v40 = vsel %vm350_vm9, 1.0, %v1133_v10  ;;  %1026 = vmatpush3.msra.mxu0 %v887_v2 }
 0x4c3   :  { %1027 = vmatprep.subr.mxu0 %v1133_v10 }
 0x4c4   :  { %1028 = vmatpush3.msra.mxu0 %v884_v42 }
 0x4c5   :  { %1029 = vmatprep.subr.mxu0 %v1133_v10 }
 0x4c6   :  { %1030 = vmatpush3.msra.mxu0 %v883_v43 }
 0x56c   :  { %v453_v35 = vpop.f32.mrf.mxu0 }
 0x56e   :  { %v455_v36 = vpop.f32.mrf.mxu0 }
 0x570   :  { %v459_v37 = vpop.f32.mrf.mxu0 }
 0x572   :  { %v461_v39 = vpop.f32.mrf.mxu0 }
 0x573   :  { %1005 = vmatpush3.msra.mxu1 %v461_v39 }
 0x574   :  { %1006 = vmatprep.subr.mxu1 %v1133_v10 }
 0x575   :  { %1007 = vmatpush3.msra.mxu1 %v455_v36 }
 0x576   :  { %1008 = vmatprep.subr.mxu1 %v1133_v10 }
 0x577   :  { %1009 = vmatpush3.msra.mxu1 %v459_v37 }
 0x578   :  { %1010 = vmatprep.subr.mxu1 %v1133_v10 }
 0x579   :  { %1011 = vmatpush3.msra.mxu1 %v453_v35 }
 0x57a   :  { %1013 = vmatmul.mubr.msk.f32.vlgmr.msra.gmra.mxu1 %vm152_vm3, %v351_v40  ;;  %1034 = vmatprep.subr.mxu1 %v1133_v10 }
 0x57b   :  { %1042 = vmatprep.mubr.msk.f32.mxu1 %vm1137_vm6, %v1133_v10  ;;  %1035 = vmatpush3.msra.mxu1 %v904_v45 }
 0x57c   :  { %1036 = vmatprep.subr.mxu1 %v1133_v10 }
 0x57d   :  { %1037 = vmatpush3.msra.mxu1 %v903_v52 }
 0x57e   :  { %1038 = vmatprep.subr.mxu1 %v1133_v10 }
 0x57f   :  { %1039 = vmatpush3.msra.mxu1 %v900_v54 }
 0x580   :  { %1040 = vmatprep.subr.mxu1 %v1133_v10 }
 0x581   :  { %1041 = vmatpush3.msra.mxu1 %v899_v55 }
 0x582   :  { %1045 = vmatprep.subr.mxu1 %v1133_v10 }
 0x63a   :  { %v537_v48 = vpop.f32.mrf.mxu1 }
 0x63b   :  { %v538_v49 = vadd.f32 %v537_v48, %v467_v47 }
 0x63c   :  { %v1014_v50 = vpop.f32.mrf.mxu1 }
 0x63d   :  { %v541_v51 = vmax.f32 %v538_v49, 0.0 }
 0x63f   :  { %1032 = vmatmul.mubr.msk.f32.vlgmr.msra.gmra.mxu0 %vm562_vm10, %v541_v51 }
 0x6ff   :  { %v632_v59 = vpop.f32.mrf.mxu0 }
 0x700   :  { %v633_v60 = vadd.f32 %v632_v59, %v561_v57 }
 0x701   :  { %v1033_v61 = vpop.f32.mrf.mxu0 }
 0x702   :  { %v636_v63 = vmax.f32 %v633_v60, 0.0 }
 0x704   :  { %1043 = vmatmul.mubr.msk.f32.vlgmr.msra.gmra.mxu1 %vm152_vm3, %v636_v63 }
 0x705   :  { %1046 = vmatpush3.msra.mxu1 %v920_v62  ;;  %1061 = vmatprep.mubr.msk.f32.mxu1 %vm1137_vm6, %v1133_v10 }
 0x706   :  { %1047 = vmatprep.subr.mxu1 %v1133_v10 }
 0x707   :  { %1048 = vmatpush3.msra.mxu1 %v919_v3 }
 0x708   :  { %1049 = vmatprep.subr.mxu1 %v1133_v10 }
 0x709   :  { %1050 = vmatpush3.msra.mxu1 %v916_v6 }
 0x70a   :  { %1051 = vmatprep.subr.mxu1 %v1133_v10 }
 0x70b   :  { %1052 = vmatpush3.msra.mxu1 %v915_v8 }
 0x70c   :  { %1053 = vmatprep.subr.mxu1 %v1133_v10 }
 0x70d   :  { %1054 = vmatpush3.msra.mxu1 %v912_v9 }
 0x70e   :  { %1055 = vmatprep.subr.mxu1 %v1133_v10 }
 0x70f   :  { %1056 = vmatpush3.msra.mxu1 %v911_v11 }
 0x710   :  { %1057 = vmatprep.subr.mxu1 %v1133_v10 }
 0x711   :  { %1058 = vmatpush3.msra.mxu1 %v908_v14 }
 0x712   :  { %1059 = vmatprep.subr.mxu1 %v1133_v10 }
 0x713   :  { %1060 = vmatpush3.msra.mxu1 %v907_v15 }
 0x7c4   :  { %v718_v18 = vpop.f32.mrf.mxu1 }
 0x7c5   :  { %v719_v19 = vadd.f32 %v718_v18, %v648_v17 }
 0x7c6   :  { %v1044_v20 = vpop.f32.mrf.mxu1 }
 0x7c7   :  { %v722_v21 = vmax.f32 %v719_v19, 0.0 }
 0x7c9   :  { %1062 = vmatmul.mubr.msk.f32.vlgmr.msra.gmra.mxu1 %vm562_vm10, %v722_v21 }
 0x889   :  { %v812_v25 = vpop.f32.mrf.mxu1 }
 0x88a   :  { %v813_v10 = vadd.f32 %v812_v25, %v742_v24 }
 0x88b   :  { %v1063_v26 = vpop.f32.mrf.mxu1 }
 0x88c   :  { %824 = vperm.xlu1 %1076, %v813_v10   ;;  %v817_v27 = vsel %vm816_vm11, %v813_v10, 0.0 }
 0x88d   :  { %818 = vadd.xlane.f32.xlu0 %v817_v27 }
 0x907   :  { %v825_v5 = vpop.permute.xlu1 %824 }
 0x908   :  { %v827_v29 = vadd.f32 %v825_v5, %v813_v10 }
 0x916   :  { %v819_v28 = vpop.xlane.xlu0 %818 }
 0x917   :  { %v821_v30 = vmul.f32 0.0625, %v819_v28 }
 0x919   :  { %v828_v31 = vsub.f32 %v827_v29, %v821_v30 }
 0x91b   :  { %829 = vst [vmem:[#allocation5] sm:$0xf] %v828_v31 }
 0x91c   :  { %1117 = shalt.err (!%p1114_p9)
}
 0x91d   :  { %839 = dma.vmem_to_hbm [thread:$0]  %s837_s24, 64, %s1273_s3, [#allocation4]  }
 0x91e   :  { %1128 = dma.done.wait [#allocation4], 64  }
 0x91f   :  { %1129 = vsyncadd [#allocation4], 4294967232 }
 0x920   :  { %843 = vsyncpa [#allocation3], 1 }
 0x921   :  { %844 = vsyncpa [#allocation4], 1 }

</bundles_post_ra>
